<compile_context>
chip_gen: v7x
topology: tpu7x:2x2x1
jax: 0.10.0
libtpu: 0.0.40
codegen_flags: <defaults>
</compile_context>

<pallas_src>
import math

import jax
import jax.numpy as jnp
import numpy as np
from jax import lax
from jax.experimental import pallas as pl
from jax.experimental.pallas import tpu as pltpu


# ---------------------------------------------------------------------------
# Kernel 1: RoutingModule hot path (fused Wq/Wk projection + cosine sim).
# grid = (B, L // T); one (T, D) sequence tile per step.
# ---------------------------------------------------------------------------
def routing_kernel(x_ref, kwrap_ref, w_ref, bias_ref, p_ref, carry_ref):
    t = pl.program_id(1)
    x = x_ref[0]                                   # (T, D)
    T, D = x.shape

    # Single fused MXU matmul: (T, D) @ (D, 2D) + (1, 2D) -> (T, 2D).
    qk = jnp.dot(x, w_ref[...], preferred_element_type=jnp.float32) + bias_ref[...]
    q = qk[:, :D]                                  # Wq(x) rows
    k_pre = qk[:, D:]                              # Wk(x) rows, un-shifted

    # k[i] = k_pre[i-1]: XLU rotate (no scratch stores / reload), then patch
    # row 0 with the value carried across the tile seam:
    #   tile 0     -> Wk(x[:, L-1]) + bk  (torch.roll wrap row, from glue)
    #   tile t > 0 -> last k_pre row of the previous tile (carry scratch).
    prev = jnp.where(t == 0, kwrap_ref[0], carry_ref[...])         # (1, D)
    k_rolled = pltpu.roll(k_pre, shift=1, axis=0)                  # (T, D)
    row = lax.broadcasted_iota(jnp.int32, (T, 1), 0)
    k = jnp.where(row == 0, prev, k_rolled)
    carry_ref[...] = k_pre[T - 1:T, :]             # seam carry for next tile

    # Cosine similarity with a single EUP rsqrt:
    #   max(|q|*|k|, eps) == sqrt(max(qq*kk, eps^2)), eps = 1e-8 like torch.
    dot = jnp.sum(q * k, axis=-1, keepdims=True)   # (T, 1)
    qq = jnp.sum(q * q, axis=-1, keepdims=True)
    kk = jnp.sum(k * k, axis=-1, keepdims=True)
    cos = dot * lax.rsqrt(jnp.maximum(qq * kk, jnp.float32(1e-16)))

    p = 0.5 * (1.0 - cos)                          # (T, 1)
    p = jnp.where(jnp.logical_and(row == 0, t == 0), jnp.float32(1.0), p)
    p_ref[...] = p[None]                           # (1, T, 1)


def routing_forward(x, wq, bq, wk, bk, *, seq_block=None):
    """Equivalent of RoutingModule.forward (returns p of shape (B, L))."""
    B, L, D = x.shape
    T = seq_block if seq_block is not None else min(L, 512)
    assert L % T == 0, "seq length must be divisible by the sequence tile"
    nT = L // T

    # Fuse Wq / Wk so the projection is ONE MXU matmul per tile.
    w_qk = jnp.concatenate([wq.T, wk.T], axis=1)          # (D, 2D)
    b_qk = jnp.concatenate([bq, bk]).reshape(1, 2 * D)    # (1, 2D)
    # torch.roll wrap row: k row 0 uses x[:, L-1]. Tiny (B, D) GEMM in glue.
    k_wrap = (x[:, L - 1, :] @ wk.T + bk).reshape(B, 1, D)

    compiler_kwargs = dict(dimension_semantics=("parallel", "arbitrary"))
    # Raise the scoped-VMEM ceiling only when the per-step working set needs
    # it (production shapes); at small shapes keep the compiler default.
    approx_vmem = 4 * (2 * T * D          # double-buffered x tile
                       + 4 * T * D        # qk intermediate + rolled k
                       + 2 * D * 2 * D    # resident fused weight
                       + 8 * T)           # p tiles + reduction columns
    if approx_vmem > 12 * 1024 * 1024:
        compiler_kwargs["vmem_limit_bytes"] = min(2 * approx_vmem, 96 * 1024 * 1024)

    p = pl.pallas_call(
        routing_kernel,
        out_shape=jax.ShapeDtypeStruct((B, L, 1), jnp.float32),
        grid=(B, nT),
        in_specs=[
            pl.BlockSpec((1, T, D), lambda b, t: (b, t, 0)),      # x tile
            pl.BlockSpec((1, 1, D), lambda b, t: (b, 0, 0)),      # wrap row
            pl.BlockSpec((D, 2 * D), lambda b, t: (0, 0)),        # fused W (resident)
            pl.BlockSpec((1, 2 * D), lambda b, t: (0, 0)),        # fused bias
        ],
        out_specs=pl.BlockSpec((1, T, 1), lambda b, t: (b, t, 0)),
        scratch_shapes=[pltpu.VMEM((1, D), jnp.float32)],          # seam carry
        compiler_params=pltpu.CompilerParams(**compiler_kwargs),
    )(x, k_wrap, w_qk, b_qk)
    return p[..., 0]                                               # (B, L)


# ---------------------------------------------------------------------------
# Kernel 2: pack the selected rows via a scalar-prefetch-driven DMA gather.
# grid = (B, L // T_pack).  src_ref[b, j] is the flat (B*L, D)-row index of
# the j-th selected row of batch b; slots j >= lengths[b] are zeroed.
# ---------------------------------------------------------------------------
def pack_kernel(src_ref, len_ref, x_hbm, out_ref, gather_buf, sem):
    bb = pl.program_id(0)
    tt = pl.program_id(1)
    T, D = gather_buf.shape
    base = tt * T

    n = len_ref[bb]                                           # selected rows in batch bb
    n_here = jnp.minimum(jnp.maximum(n - base, 0), T)         # valid slots in this tile

    @pl.loop(0, n_here)
    def _start(j):
        pltpu.make_async_copy(x_hbm.at[src_ref[bb, base + j]],
                              gather_buf.at[j], sem.at[0]).start()

    @pl.loop(0, n_here)
    def _wait(j):
        pltpu.make_async_copy(x_hbm.at[0], gather_buf.at[0], sem.at[0]).wait()

    # Copy gathered rows to the output tile; padded slots become exactly 0.
    rows = lax.broadcasted_iota(jnp.int32, (T, D), 0)
    out_ref[...] = jnp.where(rows < n_here, gather_buf[...], 0.0)[None].astype(
        out_ref.dtype)


def chunking_forward(x, wq, bq, wk, bk, *, seq_block=None, pack_block=None):
    """Equivalent of ChunkingLayer.forward, end-to-end jittable.

    Returns (packed, lengths, p, b) where packed is the statically shaped
    (B, L, D) zero-padded selection; the caller may trim to max(lengths).
    """
    B, L, D = x.shape
    p = routing_forward(x, wq, bq, wk, bk, seq_block=seq_block)   # (B, L)
    b = (p >= 0.5).astype(jnp.float32)                            # (B, L)

    # Tiny O(B*L) int32 glue: flat source-row index for each output slot.
    # Keys of selected rows are their own position, so selection order (and
    # hence the PyTorch x[i][b[i] == 1] ordering) is preserved.
    b_int = b.astype(jnp.int32)
    lengths = jnp.sum(b_int, axis=1).astype(jnp.int32)            # (B,)
    t_idx = jnp.arange(L, dtype=jnp.int32)[None, :]
    sort_key = jnp.where(b_int == 1, t_idx, t_idx + L)
    src = jnp.argsort(sort_key, axis=1).astype(jnp.int32)         # (B, L)
    src_flat = src + (jnp.arange(B, dtype=jnp.int32) * L)[:, None]

    T = pack_block if pack_block is not None else min(L, 256)
    assert L % T == 0, "seq length must be divisible by the pack tile"

    packed = pl.pallas_call(
        pack_kernel,
        out_shape=jax.ShapeDtypeStruct((B, L, D), x.dtype),
        grid_spec=pltpu.PrefetchScalarGridSpec(
            num_scalar_prefetch=2,                                 # src_flat, lengths
            grid=(B, L // T),
            in_specs=[pl.BlockSpec(memory_space=pl.ANY)],          # x rows stay in HBM
            out_specs=pl.BlockSpec((1, T, D),
                                   lambda bb, tt, sref, lref: (bb, tt, 0)),
            scratch_shapes=[pltpu.VMEM((T, D), x.dtype),
                            pltpu.SemaphoreType.DMA((1,))],
        ),
        compiler_params=pltpu.CompilerParams(
            dimension_semantics=("parallel", "parallel")),
    )(src_flat, lengths, x.reshape(B * L, D))

    return packed, lengths, p, b


# ---------------------------------------------------------------------------
# Pure-JAX/numpy reference (mirrors the PyTorch forward) for correctness.
# ---------------------------------------------------------------------------
def ref_forward(x, wq, bq, wk, bk):
    q = x @ wq.T + bq
    k = jnp.roll(x, 1, axis=1) @ wk.T + bk
    dot = jnp.sum(q * k, axis=-1)
    cos = dot / jnp.maximum(
        jnp.linalg.norm(q, axis=-1) * jnp.linalg.norm(k, axis=-1), 1e-8)
    p = 0.5 * (1.0 - cos)
    p = p.at[:, 0].set(1.0)
    b = (p >= 0.5).astype(jnp.float32)
    max_len = int(jnp.max(jnp.sum(b, axis=1)))
    out = np.zeros((x.shape[0], max_len, x.shape[-1]), np.float32)
    xn, bn = np.asarray(x), np.asarray(b)
    for i in range(x.shape[0]):
        s = xn[i][bn[i] == 1]
        out[i, : len(s)] = s
    return out, np.asarray(p), np.asarray(b)


if __name__ == "__main__":
    B, L, D = 2, 16, 32
    key = jax.random.PRNGKey(0)
    kx, kwq, kbq, kwk, kbk = jax.random.split(key, 5)

    x = jax.random.normal(kx, (B, L, D), jnp.float32)
    bound = 1.0 / math.sqrt(D)   # nn.Linear-style uniform init, deterministic
    wq = jax.random.uniform(kwq, (D, D), jnp.float32, -bound, bound)
    bq = jax.random.uniform(kbq, (D,), jnp.float32, -bound, bound)
    wk = jax.random.uniform(kwk, (D, D), jnp.float32, -bound, bound)
    bk = jax.random.uniform(kbk, (D,), jnp.float32, -bound, bound)

    # Small tiles so the multi-tile seam-carry and pack paths are exercised.
    fwd = jax.jit(chunking_forward, static_argnames=("seq_block", "pack_block"))
    packed, lengths, p, b = fwd(x, wq, bq, wk, bk, seq_block=8, pack_block=8)
    jax.block_until_ready((packed, lengths, p, b))

    # TODO(synk): the data-dependent max_len output shape has no static-shape
    # Pallas equivalent; match PyTorch with one host sync that happens only
    # AFTER both kernels have been dispatched (outside the jitted forward).
    max_len = int(jax.device_get(jnp.max(lengths)))
    sel = np.asarray(packed)[:, :max_len]

    sel_ref, p_np, b_np = ref_forward(x, wq, bq, wk, bk)
    np.testing.assert_allclose(np.asarray(p), p_np, rtol=1e-5, atol=1e-5)
    np.testing.assert_allclose(np.asarray(b), b_np, rtol=0, atol=0)
    np.testing.assert_allclose(sel, sel_ref, rtol=1e-6, atol=1e-6)

    print("KERNEL_OK")
</pallas_src>

<mosaic_0001>
module attributes {stable_mosaic.version = 11 : i64} {
  func.func @routing_kernel(%arg0: i32, %arg1: i32, %arg2: memref<1x8x32xf32, #tpu.memory_space<vmem>>, %arg3: memref<1x1x32xf32, #tpu.memory_space<vmem>>, %arg4: memref<32x64xf32, #tpu.memory_space<vmem>>, %arg5: memref<1x64xf32, #tpu.memory_space<vmem>>, %arg6: memref<1x8x1xf32, #tpu.memory_space<vmem>>, %arg7: memref<1x32xf32, #tpu.memory_space<vmem>>) attributes {dimension_semantics = [#tpu.dimension_semantics<parallel>, #tpu.dimension_semantics<arbitrary>], iteration_bounds = array<i64: 2, 2>, scalar_prefetch = 0 : i64, scratch_operands = 1 : i64, tpu.core_type = #tpu.core_type<tc>, window_params = [{transform_indices = @transform_0, window_bounds = array<i64: 1, 8, 32>}, {transform_indices = @transform_1, window_bounds = array<i64: 1, 1, 32>}, {pipeline_mode = #tpu.pipeline_mode<synchronous>, transform_indices = @transform_2, window_bounds = array<i64: 32, 64>}, {pipeline_mode = #tpu.pipeline_mode<synchronous>, transform_indices = @transform_3, window_bounds = array<i64: 1, 64>}, {transform_indices = @transform_4, window_bounds = array<i64: 1, 8, 1>}]} {
    %c0 = arith.constant 0 : index
    %c0_0 = arith.constant 0 : index
    %c0_1 = arith.constant 0 : index
    %0 = vector.load %arg2[%c0, %c0_0, %c0_1] : memref<1x8x32xf32, #tpu.memory_space<vmem>>, vector<1x8x32xf32>
    %1 = vector.shape_cast %0 : vector<1x8x32xf32> to vector<8x32xf32>
    %c0_2 = arith.constant 0 : index
    %c0_3 = arith.constant 0 : index
    %2 = vector.load %arg4[%c0_2, %c0_3] : memref<32x64xf32, #tpu.memory_space<vmem>>, vector<32x64xf32>
    %cst = arith.constant dense<0.000000e+00> : vector<8x64xf32>
    %3 = tpu.matmul %1, %2, %cst {dimension_numbers = #tpu.dot_dimension_numbers<[1], [0], [0], [1], [0, 0, 1, 1], [], []>} : vector<8x32xf32>, vector<32x64xf32>, vector<8x64xf32> -> vector<8x64xf32>
    %c0_4 = arith.constant 0 : index
    %c0_5 = arith.constant 0 : index
    %4 = vector.load %arg5[%c0_4, %c0_5] : memref<1x64xf32, #tpu.memory_space<vmem>>, vector<1x64xf32>
    %5 = vector.broadcast %4 : vector<1x64xf32> to vector<8x64xf32>
    %6 = arith.addf %3, %5 : vector<8x64xf32>
    %7 = vector.extract_strided_slice %6 {offsets = [0, 0], sizes = [8, 32], strides = [1, 1]} : vector<8x64xf32> to vector<8x32xf32>
    %8 = vector.extract_strided_slice %6 {offsets = [0, 32], sizes = [8, 32], strides = [1, 1]} : vector<8x64xf32> to vector<8x32xf32>
    %c0_i32 = arith.constant 0 : i32
    %9 = arith.cmpi eq, %arg1, %c0_i32 : i32
    %c0_6 = arith.constant 0 : index
    %c0_7 = arith.constant 0 : index
    %c0_8 = arith.constant 0 : index
    %10 = vector.load %arg3[%c0_6, %c0_7, %c0_8] : memref<1x1x32xf32, #tpu.memory_space<vmem>>, vector<1x1x32xf32>
    %11 = vector.shape_cast %10 : vector<1x1x32xf32> to vector<1x32xf32>
    %c0_9 = arith.constant 0 : index
    %c0_10 = arith.constant 0 : index
    %12 = vector.load %arg7[%c0_9, %c0_10] : memref<1x32xf32, #tpu.memory_space<vmem>>, vector<1x32xf32>
    %13 = arith.select %9, %11, %12 : vector<1x32xf32>
    %c1_i32 = arith.constant 1 : i32
    %14 = tpu.dynamic_rotate %8 by %c1_i32 dim 0 : vector<8x32xf32>, i32 -> vector<8x32xf32>
    %15 = tpu.iota {dimensions = array<i32: 0>} : vector<8x1xi32>
    %c0_i32_11 = arith.constant 0 : i32
    %16 = vector.broadcast %c0_i32_11 : i32 to vector<8x1xi32>
    %17 = arith.cmpi eq, %15, %16 : vector<8x1xi32>
    %18 = vector.shape_cast %17 : vector<8x1xi1> to vector<8x1xi1>
    %19 = vector.broadcast %18 : vector<8x1xi1> to vector<8x32xi1>
    %20 = vector.shape_cast %13 : vector<1x32xf32> to vector<1x32xf32>
    %21 = vector.broadcast %20 : vector<1x32xf32> to vector<8x32xf32>
    %22 = arith.select %19, %21, %14 : vector<8x32xi1>, vector<8x32xf32>
    %23 = vector.extract_strided_slice %8 {offsets = [7, 0], sizes = [1, 32], strides = [1, 1]} : vector<8x32xf32> to vector<1x32xf32>
    %c0_12 = arith.constant 0 : index
    %c0_13 = arith.constant 0 : index
    %24 = vector.load %arg7[%c0_12, %c0_13] : memref<1x32xf32, #tpu.memory_space<vmem>>, vector<1x32xf32>
    tpu.vector_store %arg7[%c0_12, %c0_13], %23 {strides = array<i32>} : memref<1x32xf32, #tpu.memory_space<vmem>>, vector<1x32xf32>,
    %25 = arith.mulf %7, %22 : vector<8x32xf32>
    %cst_14 = arith.constant dense<0.000000e+00> : vector<8xf32>
    %26 = vector.multi_reduction <add>, %25, %cst_14 [1] : vector<8x32xf32> to vector<8xf32>
    %27 = vector.shape_cast %26 : vector<8xf32> to vector<8x1xf32>
    %28 = arith.mulf %7, %7 : vector<8x32xf32>
    %cst_15 = arith.constant dense<0.000000e+00> : vector<8xf32>
    %29 = vector.multi_reduction <add>, %28, %cst_15 [1] : vector<8x32xf32> to vector<8xf32>
    %30 = vector.shape_cast %29 : vector<8xf32> to vector<8x1xf32>
    %31 = arith.mulf %22, %22 : vector<8x32xf32>
    %cst_16 = arith.constant dense<0.000000e+00> : vector<8xf32>
    %32 = vector.multi_reduction <add>, %31, %cst_16 [1] : vector<8x32xf32> to vector<8xf32>
    %33 = vector.shape_cast %32 : vector<8xf32> to vector<8x1xf32>
    %34 = arith.mulf %30, %33 : vector<8x1xf32>
    %cst_17 = arith.constant 1.000000e-16 : f32
    %35 = vector.broadcast %cst_17 : f32 to vector<8x1xf32>
    %36 = arith.maximumf %34, %35 : vector<8x1xf32>
    %37 = math.rsqrt %36 : vector<8x1xf32>
    %38 = arith.mulf %27, %37 : vector<8x1xf32>
    %cst_18 = arith.constant 1.000000e+00 : f32
    %39 = vector.broadcast %cst_18 : f32 to vector<8x1xf32>
    %40 = arith.subf %39, %38 : vector<8x1xf32>
    %cst_19 = arith.constant 5.000000e-01 : f32
    %41 = vector.broadcast %cst_19 : f32 to vector<8x1xf32>
    %42 = arith.mulf %41, %40 : vector<8x1xf32>
    %c0_i32_20 = arith.constant 0 : i32
    %43 = vector.broadcast %c0_i32_20 : i32 to vector<8x1xi32>
    %44 = arith.cmpi eq, %15, %43 : vector<8x1xi32>
    %c0_i32_21 = arith.constant 0 : i32
    %45 = arith.cmpi eq, %arg1, %c0_i32_21 : i32
    %46 = vector.broadcast %45 : i1 to vector<8x1xi1>
    %47 = arith.andi %44, %46 : vector<8x1xi1>
    %cst_22 = arith.constant 1.000000e+00 : f32
    %48 = vector.broadcast %cst_22 : f32 to vector<8x1xf32>
    %49 = arith.select %47, %48, %42 : vector<8x1xi1>, vector<8x1xf32>
    %50 = vector.shape_cast %49 : vector<8x1xf32> to vector<1x8x1xf32>
    %c0_23 = arith.constant 0 : index
    %c0_24 = arith.constant 0 : index
    %c0_25 = arith.constant 0 : index
    %51 = vector.load %arg6[%c0_23, %c0_24, %c0_25] : memref<1x8x1xf32, #tpu.memory_space<vmem>>, vector<1x8x1xf32>
    tpu.vector_store %arg6[%c0_23, %c0_24, %c0_25], %50 {strides = array<i32>} : memref<1x8x1xf32, #tpu.memory_space<vmem>>, vector<1x8x1xf32>,
    return
  }
  func.func @transform_0(%arg0: i32, %arg1: i32) -> (i32, i32, i32) {
    %c0_i32 = arith.constant 0 : i32
    %c0_i32_0 = arith.constant 0 : i32
    return %arg0, %arg1, %c0_i32 : i32, i32, i32
  }
  func.func @transform_1(%arg0: i32, %arg1: i32) -> (i32, i32, i32) {
    %c0_i32 = arith.constant 0 : i32
    %c0_i32_0 = arith.constant 0 : i32
    %c0_i32_1 = arith.constant 0 : i32
    return %arg0, %c0_i32, %c0_i32_0 : i32, i32, i32
  }
  func.func @transform_2(%arg0: i32, %arg1: i32) -> (i32, i32) {
    %c0_i32 = arith.constant 0 : i32
    %c0_i32_0 = arith.constant 0 : i32
    %c0_i32_1 = arith.constant 0 : i32
    return %c0_i32, %c0_i32_0 : i32, i32
  }
  func.func @transform_3(%arg0: i32, %arg1: i32) -> (i32, i32) {
    %c0_i32 = arith.constant 0 : i32
    %c0_i32_0 = arith.constant 0 : i32
    %c0_i32_1 = arith.constant 0 : i32
    return %c0_i32, %c0_i32_0 : i32, i32
  }
  func.func @transform_4(%arg0: i32, %arg1: i32) -> (i32, i32, i32) {
    %c0_i32 = arith.constant 0 : i32
    %c0_i32_0 = arith.constant 0 : i32
    return %arg0, %arg1, %c0_i32 : i32, i32, i32
  }
}

module attributes {stable_mosaic.version = 11 : i64} {
  func.func @pack_kernel(%arg0: i32, %arg1: i32, %arg2: memref<2x16xi32, #tpu.memory_space<smem>>, %arg3: memref<2xi32, #tpu.memory_space<smem>>, %arg4: memref<32x32xf32, #tpu.memory_space<any>>, %arg5: memref<1x8x32xf32, #tpu.memory_space<vmem>>, %arg6: memref<8x32xf32, #tpu.memory_space<vmem>>, %arg7: memref<1x!tpu.dma_semaphore, #tpu.memory_space<semaphore_mem>>) attributes {dimension_semantics = [#tpu.dimension_semantics<parallel>, #tpu.dimension_semantics<parallel>], iteration_bounds = array<i64: 2, 2>, scalar_prefetch = 2 : i64, scratch_operands = 2 : i64, tpu.core_type = #tpu.core_type<tc>, window_params = [{}, {transform_indices = @transform_1, window_bounds = array<i64: 1, 8, 32>}]} {
    %c8_i32 = arith.constant 8 : i32
    %0 = arith.muli %arg1, %c8_i32 : i32
    %1 = arith.index_cast %arg0 : i32 to index
    %2 = memref.load %arg3[%1] : memref<2xi32, #tpu.memory_space<smem>>
    %3 = arith.subi %2, %0 : i32
    %c0_i32 = arith.constant 0 : i32
    %4 = arith.maxsi %3, %c0_i32 : i32
    %c8_i32_0 = arith.constant 8 : i32
    %5 = arith.minsi %4, %c8_i32_0 : i32
    %c0_i32_1 = arith.constant 0 : i32
    %6 = arith.subi %5, %c0_i32_1 : i32
    %c1_i32 = arith.constant 1 : i32
    %c1_i32_2 = arith.constant 1 : i32
    %7 = arith.subi %c1_i32, %c1_i32_2 : i32
    %8 = arith.addi %6, %7 : i32
    %c1_i32_3 = arith.constant 1 : i32
    %9 = arith.divsi %8, %c1_i32_3 : i32
    %c1_i32_4 = arith.constant 1 : i32
    %c0_i32_5 = arith.constant 0 : i32
    %c0_i32_6 = arith.constant 0 : i32
    %10 = arith.subi %9, %c0_i32_6 : i32
    %11 = arith.addi %c0_i32_6, %10 : i32
    %c1_i32_7 = arith.constant 1 : i32
    scf.for %arg8 = %c0_i32_6 to %11 step %c1_i32_7  : i32 {
      %26 = arith.muli %arg8, %c1_i32_4 : i32
      %27 = arith.addi %c0_i32_5, %26 : i32
      %28 = arith.addi %0, %27 : i32
      %29 = arith.index_cast %arg0 : i32 to index
      %30 = arith.index_cast %28 : i32 to index
      %31 = memref.load %arg2[%29, %30] : memref<2x16xi32, #tpu.memory_space<smem>>
      %c0_i32_20 = arith.constant 0 : i32
      %c0_i32_21 = arith.constant 0 : i32
      %32 = tpu.memref_slice %arg4[%31, %c0_i32_21] : memref<32x32xf32, #tpu.memory_space<any>> -> memref<1x32xf32, #tpu.memory_space<any>>
      %33 = tpu.memref_squeeze %32 : memref<1x32xf32, #tpu.memory_space<any>> -> memref<32xf32, #tpu.memory_space<any>>
      %c0_i32_22 = arith.constant 0 : i32
      %34 = tpu.memref_slice %arg6[%27, %c0_i32_22] : memref<8x32xf32, #tpu.memory_space<vmem>> -> memref<1x32xf32, #tpu.memory_space<vmem>>
      %35 = tpu.memref_squeeze %34 : memref<1x32xf32, #tpu.memory_space<vmem>> -> memref<32xf32, #tpu.memory_space<vmem>>
      %36 = tpu.memref_slice %arg7[%c0_i32_20] : memref<1x!tpu.dma_semaphore, #tpu.memory_space<semaphore_mem>> -> memref<1x!tpu.dma_semaphore, #tpu.memory_space<semaphore_mem>>
      %37 = tpu.memref_squeeze %36 : memref<1x!tpu.dma_semaphore, #tpu.memory_space<semaphore_mem>> -> memref<!tpu.dma_semaphore, #tpu.memory_space<semaphore_mem>>
      tpu.enqueue_dma source(%33 : memref<32xf32, #tpu.memory_space<any>>) target(%35 : memref<32xf32, #tpu.memory_space<vmem>>) target_semaphore(%37 : memref<!tpu.dma_semaphore, #tpu.memory_space<semaphore_mem>>)
    }
    %c0_i32_8 = arith.constant 0 : i32
    %12 = arith.subi %5, %c0_i32_8 : i32
    %c1_i32_9 = arith.constant 1 : i32
    %c1_i32_10 = arith.constant 1 : i32
    %13 = arith.subi %c1_i32_9, %c1_i32_10 : i32
    %14 = arith.addi %12, %13 : i32
    %c1_i32_11 = arith.constant 1 : i32
    %15 = arith.divsi %14, %c1_i32_11 : i32
    %c1_i32_12 = arith.constant 1 : i32
    %c0_i32_13 = arith.constant 0 : i32
    %c0_i32_14 = arith.constant 0 : i32
    %16 = arith.subi %15, %c0_i32_14 : i32
    %17 = arith.addi %c0_i32_14, %16 : i32
    %c1_i32_15 = arith.constant 1 : i32
    scf.for %arg8 = %c0_i32_14 to %17 step %c1_i32_15  : i32 {
      %26 = arith.muli %arg8, %c1_i32_12 : i32
      %27 = arith.addi %c0_i32_13, %26 : i32
      %c0_i32_20 = arith.constant 0 : i32
      %c0_i32_21 = arith.constant 0 : i32
      %c0_i32_22 = arith.constant 0 : i32
      %c0_i32_23 = arith.constant 0 : i32
      %28 = tpu.memref_slice %arg4[%c0_i32_20, %c0_i32_23] : memref<32x32xf32, #tpu.memory_space<any>> -> memref<1x32xf32, #tpu.memory_space<any>>
      %29 = tpu.memref_squeeze %28 : memref<1x32xf32, #tpu.memory_space<any>> -> memref<32xf32, #tpu.memory_space<any>>
      %c0_i32_24 = arith.constant 0 : i32
      %30 = tpu.memref_slice %arg6[%c0_i32_21, %c0_i32_24] : memref<8x32xf32, #tpu.memory_space<vmem>> -> memref<1x32xf32, #tpu.memory_space<vmem>>
      %31 = tpu.memref_squeeze %30 : memref<1x32xf32, #tpu.memory_space<vmem>> -> memref<32xf32, #tpu.memory_space<vmem>>
      %32 = tpu.memref_slice %arg7[%c0_i32_22] : memref<1x!tpu.dma_semaphore, #tpu.memory_space<semaphore_mem>> -> memref<1x!tpu.dma_semaphore, #tpu.memory_space<semaphore_mem>>
      %33 = tpu.memref_squeeze %32 : memref<1x!tpu.dma_semaphore, #tpu.memory_space<semaphore_mem>> -> memref<!tpu.dma_semaphore, #tpu.memory_space<semaphore_mem>>
      tpu.wait_dma2 semaphore(%33 : memref<!tpu.dma_semaphore, #tpu.memory_space<semaphore_mem>>) src(%29 : memref<32xf32, #tpu.memory_space<any>>) dst(%31 : memref<32xf32, #tpu.memory_space<vmem>>)
    }
    %18 = tpu.iota {dimensions = array<i32: 0>} : vector<8x32xi32>
    %19 = vector.broadcast %5 : i32 to vector<8x32xi32>
    %20 = arith.cmpi slt, %18, %19 : vector<8x32xi32>
    %c0 = arith.constant 0 : index
    %c0_16 = arith.constant 0 : index
    %21 = vector.load %arg6[%c0, %c0_16] : memref<8x32xf32, #tpu.memory_space<vmem>>, vector<8x32xf32>
    %cst = arith.constant 0.000000e+00 : f32
    %22 = vector.broadcast %cst : f32 to vector<8x32xf32>
    %23 = arith.select %20, %21, %22 : vector<8x32xi1>, vector<8x32xf32>
    %24 = vector.shape_cast %23 : vector<8x32xf32> to vector<1x8x32xf32>
    %c0_17 = arith.constant 0 : index
    %c0_18 = arith.constant 0 : index
    %c0_19 = arith.constant 0 : index
    %25 = vector.load %arg5[%c0_17, %c0_18, %c0_19] : memref<1x8x32xf32, #tpu.memory_space<vmem>>, vector<1x8x32xf32>
    tpu.vector_store %arg5[%c0_17, %c0_18, %c0_19], %24 {strides = array<i32>} : memref<1x8x32xf32, #tpu.memory_space<vmem>>, vector<1x8x32xf32>,
    return
  }
  func.func @transform_1(%arg0: i32, %arg1: i32, %arg2: memref<2x16xi32, #tpu.memory_space<smem>>, %arg3: memref<2xi32, #tpu.memory_space<smem>>) -> (i32, i32, i32) {
    %c0_i32 = arith.constant 0 : i32
    %c0_i32_0 = arith.constant 0 : i32
    return %arg0, %arg1, %c0_i32 : i32, i32, i32
  }
}

</mosaic_0001>

<bundles_post_ra>
// kernel: chunking_forward.3
= control target key start
LH: loop header
LB: loop body
LE: loop exit
PB: predicated region body
PF: predicated region fallthrough
CT: control target
= control target key end

     0   :  { %s611_s0 = inlined_call_operand.vmem [shape: s32[2,16], index: 0, kind: input, shape index: {}]   ;;  %s612_s2 = inlined_call_operand.vmem [shape: f32[32,32], index: 2, kind: input, shape index: {}]   ;;  %s613_s3 = inlined_call_operand.hbm [shape: f32[2,16,32], index: 3, kind: output, shape index: {}]   ;;  %s614_s1 = inlined_call_operand.vmem [shape: s32[2], index: 1, kind: input, shape index: {}]  }
   0x1   :  { %s8_s14 = sshll.u32 %s611_s0, 4  ;;  %s12_s17 = sshll.u32 %s614_s1, 4  ;;  %s9_s14 = int_to_ptr.vmem [resolvable:$true] %s8_s14  ;;  %s13_s17 = int_to_ptr.vmem [resolvable:$true] %s12_s17 }
   0x2   :  { %s336_s18 = scalar_lea.vmem %s9_s14, 32  ;;  %p341_p1 = scmp.lt.s32.totalorder %s9_s14, %s9_s14 }
   0x3   :  { %p337_p0 = scmp.ne.s32.totalorder %s9_s14, %s336_s18  ;;  %p342_p2 = scmp.lt.s32.totalorder %s336_s18, %s336_s18 }
   0x5   :  { %p343_p3 = por %p342_p2, %p341_p1 }
   0x7   :  { %p344_p4 = pnand %p343_p3, %p337_p0 }
   0x9   :  { %347 = shalt.err (!%p344_p4)  }
   0xa   :  { %s452_s19 = smov [#allocation5]   ;;  %s348_s20 = scalar_lea.vmem %s13_s17, 16 }
   0xb   :  { %11 = dma.vmem_to_smem %s9_s14, 32, %s452_s19, [#allocation4] }
   0xc   :  { %p349_p5 = scmp.ne.s32.totalorder %s13_s17, %s348_s20  ;;  %p353_p6 = scmp.lt.s32.totalorder %s13_s17, %s13_s17 }
   0xd   :  { %p354_p7 = scmp.lt.s32.totalorder %s348_s20, %s348_s20 }
   0xf   :  { %p355_p8 = por %p354_p7, %p353_p6 }
  0x11   :  { %p356_p9 = pnand %p355_p8, %p349_p5 }
  0x13   :  { %359 = shalt.err (!%p356_p9)  }
  0x14   :  { %s453_s0 = smov [#allocation6]  }
  0x15   :  { %15 = dma.vmem_to_smem %s13_s17, 16, %s453_s0, [#allocation4] }
  0x16   :  { %416 = dma.done.wait [#allocation4], 48 }
  0x17   :  { %417 = vsyncadd [#allocation4], 4294967248 }
  0x18   :  { %17 = sfence }
  0x19   :  { %18 = vsyncpa [#allocation8], 0 }
  0x1a   :  { %20 = vsyncpa [#allocation8 + $0x1], 0  ;;  %s481_s1 = smov 0   ;;  %s483_s21 = smov 0  }
  0x1b   :  { %s485_s22 = smov 0   ;;  %s487_s23 = smov 0  }
  0x1c   :  { %s489_s24 = smov 0  }
  0x1d LB: > { %s32_s25 = sadd.s32 1, %s434_s22  ;;  %s35_s26 = sadd.s32 1, %s438_s23  ;;  %s442_s24 = sphi %s489_s24, %s26_s24   ;;  %s438_s23 = sphi %s487_s23, %s620_s23   ;;  %s434_s22 = sphi %s485_s22, %s619_s22   ;;  %s430_s21 = sphi %s483_s21, %s618_s21   ;;  %s426_s1 = sphi %s481_s1, %s617_s1  }
  0x1e   : > { %p33_p10 = scmp.ge.s32.totalorder %s32_s25, 2  ;;  %s250_s27 = sadd.s32 4294967295, %s442_s24  }
  0x1f   : > { %p53_p11 = scmp.ne.s32.totalorder %s430_s21, %s426_s1  ;;  %p54_p13 = scmp.eq.s32.totalorder %s250_s27, 3 }
  0x20   : > { %s622_s25 = smov (%p33_p10, %s32_s25), 0  ;;  %s624_s26 = smov (!%p33_p10, %s35_s26), %s438_s23 }
  0x21   : > { %p37_p12 = scmp.ge.s32.totalorder %s624_s26, 2  ;;  %s40_s28 = ssub.s32 %s434_s22, %s622_s25 }
  0x22   : > { %p518_p0 = por %p54_p13, %p53_p11  ;;  %s44_s4 = sadd.s32 1, %s430_s21 }
  0x23   : > { %s626_s26 = smov (%p37_p12, %s624_s26), 0  ;;  %p48_p1 = scmp.eq.s32.totalorder %s442_s24, 3 }
  0x24   : > { %s39_s30 = ssub.s32 %s438_s23, %s626_s26  ;;  %p252_p5 = scmp.ge.s32.totalorder %s442_s24, 4 }
  0x25   : > { %s41_s5 = sor.u32 %s40_s28, %s39_s30  ;;  %s68_s8 = sand.u32 (!%p252_p5), 1, %s430_s21  }
  0x26   : > { %p42_p2 = scmp.eq.s32.totalorder %s41_s5, 0  ;;  %p251_p3 = scmp.ne.s32.totalorder %s41_s5, 0 }
  0x27   : > { %63 = sbr.rel (%p252_p5) target bundleno = 129 (0x81), region = 12  ;;  %s537_s9 = sshll.u32 (!%p252_p5), %s68_s8, 3 }
  0x28   : > { %s527_s6 = scalar_select %p42_p2, %s430_s21, %s44_s4  }
  0x29   : > { %p529_p4 = por %p251_p3, %p48_p1  ;;  %s72_s10 = sld [smem:[#allocation6 + %s438_s23]] (!%p252_p5) }
  0x2a   : > { %s254_s11 = sshll.u32 (!%p252_p5), %s434_s22, 3  ;;  %s70_s13 = scalar_lea.vmem (!%p252_p5), [#allocation7], %s537_s9 }
  0x2f   : > { %s73_s12 = ssub.s32 %s72_s10, %s254_s11 }
  0x30   : > { %p74_p6 = scmp.gt.s32.totalorder %s73_s12, 0  ;;  %p255_p7 = scmp.lt.s32.totalorder %s73_s12, 8 }
  0x32   : > { %s628_s12 = smov (!%p74_p6, %s73_s12), 0 }
  0x33   : > { %s630_s12 = smov (!%p255_p7, %s628_s12), 8 }
  0x34   : > { %p260_p8 = scmp.le.s32.totalorder %s630_s12, 0 }
  0x35   : > { %s444_s14 = smov (!%p260_p8), 0  }
  0x36   : > { %225 = sbr.rel (%p260_p8) target bundleno = 85 (0x55), region = 94 }
  0x3d LB: >> { %s84_s15 = sadd.s32 %s446_s14, %s254_s11  ;;  %s94_s4 = scalar_lea.vmem [#allocation2], %s446_s14  ;;  %s446_s14 = sphi %s444_s14, %s81_s14  }
  0x3e   : >> { %s85_s16 = sshra.s32 %s84_s15, 7  ;;  %s90_s17 = sand.u32 127, %s84_s15 }
  0x3f   : >> { %s87_s18 = sadd.s32 %s438_s23, %s85_s16 }
  0x40   : >> { %s261_s19 = sshll.u32 %s87_s18, 7 }
  0x41   : >> { %s91_s20 = sadd.s32 %s261_s19, %s90_s17 }
  0x42   : >> { %s92_s0 = sld [smem:[#allocation5 + %s91_s20]] }
  0x48   : >> { %s93_s30 = scalar_lea.vmem %s612_s2, %s92_s0 }
  0x49   : >> { %v112_v0 = vld [vmem:[%s93_s30] sm:$0x1] }
  0x4a   : >> { %113 = vst [vmem:[%s94_s4] sm:$0x1] %v112_v0 }
  0x4b   : >> { %138 = vsyncadd [#allocation3], 16  ;;  %s81_s14 = sadd.s32 1, %s446_s14  }
  0x4c   : >> { %p80_p9 = scmp.ge.s32.totalorder %s81_s14, %s630_s12 }
  0x4e   : > { %83 = sbr.rel (!%p80_p9) target bundleno = 61 (0x3d), region = 100 }
  0x55 PF: > { %230 = sbr.rel (%p260_p8) target bundleno = 103 (0x67), region = 105  ;;  %s448_s5 = smov (!%p260_p8), 0  }
  0x5c LB: >> { %418 = dma.done.wait [#allocation3], 16  ;;  %s450_s5 = sphi %s448_s5, %s142_s5  }
  0x5d   : >> { %419 = vsyncadd [#allocation3], 4294967280  ;;  %s142_s5 = sadd.s32 1, %s450_s5  }
  0x5e   : >> { %p141_p10 = scmp.ge.s32.totalorder %s142_s5, %s630_s12 }
  0x60   : > { %144 = sbr.rel (!%p141_p10) target bundleno = 92 (0x5c), region = 111 }
  0x67 PF: > { %v147_v1 = vlaneseq  ;;  %s264_s10 = sshll.u32 %s438_s23, 1  ;;  %v149_v2 = vstv %s630_s12  ;;  %s171_s14 = sshll.u32 %s70_s13, 4  ;;  %vm153_vm0 = vcmask 261120   ;;  %s565_s14 = int_to_ptr.vmem [resolvable:$true] %s171_s14 }
  0x68   : > { %s167_s11 = sadd.s32 %s434_s22, %s264_s10  ;;  %v151_v4 = vld [vmem:[#allocation2] sm:$0xff]  ;;  %s156_s22 = scalar_lea.sflag [#allocation8], %s68_s8 }
  0x69   : > { %v148_v3 = vshrl.u32 %v147_v1, 7  ;;  %s265_s15 = sshll.u32 %s167_s11, 7  ;;  %s360_s23 = scalar_lea.vmem %s565_s14, 128 }
  0x6a   : > { %s563_s18 = scalar_lea.hbm %s613_s3, %s265_s15  ;;  %p361_p11 = scmp.ne.s32.totalorder %s565_s14, %s360_s23 }
  0x6b   : > { %vm150_vm1 = vcmp.lt.s32.totalorder %v148_v3, %v149_v2  ;;  %s454_s12 = smov [#allocation7]  }
  0x6c   : > { %v152_v5 = vsel %vm150_vm1, %v151_v4, 0.0  ;;  %p362_p12 = pnand %p361_p11, %p529_p4  ;;  %s364_s19 = sshll.u32 %s454_s12, 4  ;;  %s365_s19 = int_to_ptr.vmem [resolvable:$false] %s364_s19 }
  0x6d   : > { %154 = vst.msk [vmem:[%s70_s13] sm:$0xff] %vm153_vm0, %v152_v5  ;;  %s366_s20 = scalar_lea.vmem %s365_s19, 256  ;;  %p367_p1 = scmp.lt.s32.totalorder %s565_s14, %s365_s19 }
  0x6e   : > { %p363_p13 = pneg %p362_p12  ;;  %p368_p2 = scmp.lt.s32.totalorder %s366_s20, %s360_s23 }
  0x70   : > { %p369_p3 = por %p368_p2, %p367_p1 }
  0x72   : > { %p370_p5 = pnand %p369_p3, %p363_p13 }
  0x74   : > { %373 = shalt.err (!%p370_p5)
}
  0x75   : > { %s374_s8 = scalar_lea.hbm %s563_s18, 128  ;;  %s378_s0 = scalar_lea.hbm %s613_s3, 512 }
  0x76   : > { %p375_p6 = scmp.ne.s32.totalorder %s563_s18, %s374_s8  ;;  %p379_p9 = scmp.lt.u32.totalorder %s563_s18, %s613_s3 }
  0x77   : > { %p380_p10 = scmp.lt.u32.totalorder %s378_s0, %s374_s8  ;;  %p382_p12 = scmp.lt.u32.totalorder %s374_s8, %s563_s18 }
  0x78   : > { %p376_p7 = pnand %p375_p6, %p529_p4 }
  0x79   : > { %p381_p11 = por %p380_p10, %p379_p9 }
  0x7a   : > { %p377_p8 = pneg %p376_p7 }
  0x7b   : > { %p383_p13 = por %p382_p12, %p381_p11 }
  0x7d   : > { %p384_p1 = pnand %p383_p13, %p377_p8 }
  0x7f   : > { %387 = shalt.err (!%p384_p1)
}
  0x80   : > { %271 = dma.vmem_to_hbm [thread:$0]  (%p529_p4), %s565_s14, 128, %s563_s18, %s156_s22  }
  0x81 PF: > { %p277_p2 = scmp.ge.s32.totalorder %s442_s24, 1  ;;  %s183_s30 = sand.u32 1, %s426_s1  }
  0x82   : > { %s184_s4 = scalar_lea.sflag [#allocation8], %s183_s30 }
  0x83   : > { %p274_p3 = pnand %p277_p2, %p518_p0 }
  0x85   : > { %421 = dma.done.wait (!%p274_p3), %s184_s4, 128  }
  0x86   : > { %423 = vsyncadd (!%p274_p3), %s184_s4, 4294967168  ;;  %s26_s24 = sadd.s32 1, %s442_s24   ;;  %s617_s1 = smov %s430_s21 }
  0x87   : > { %p23_p5 = scmp.ge.s32.totalorder %s26_s24, 5   ;;  %s618_s21 = smov %s527_s6 }
  0x88   : > { %s619_s22 = smov %s622_s25  ;;  %s620_s23 = smov %s626_s26 }
  0x89   :  { %25 = sbr.rel (!%p23_p5) target bundleno = 29 (0x1d), region = 122 }
  0x90   :  { %189 = vsyncpa [#allocation8], 1 }
  0x91   :  { %191 = vsyncpa [#allocation8 + $0x1], 1 }
  0x92   :  { %192 = vsyncmov [#allocation3] }
  0x95   :  { %s193_s29 = vpop.sfrf %192 }
  0x96   :  { %p268_p0 = scmp.ne.s32.totalorder %s193_s29, 0 }
  0x98   :  { %197 = shalt.err (%p268_p0)  }

// kernel: chunking_forward.2
= control target key start
LH: loop header
LB: loop body
LE: loop exit
PB: predicated region body
PF: predicated region fallthrough
CT: control target
= control target key end

     0   :  { %s622_s15 = smov 0   ;;  %s624_s16 = smov 0   ;;  %s717_s0 = inlined_call_operand.vmem [shape: f32[2,16,32], index: 0, kind: input, shape index: {}]   ;;  %s718_s1 = inlined_call_operand.vmem [shape: f32[2,1,32], index: 1, kind: input, shape index: {}]   ;;  %s719_s2 = inlined_call_operand.vmem [shape: f32[32,64], index: 2, kind: input, shape index: {}]   ;;  %s720_s3 = inlined_call_operand.vmem [shape: f32[1,64], index: 3, kind: input, shape index: {}]   ;;  %s721_s4 = inlined_call_operand.vmem [shape: f32[2,16,1], index: 4, kind: output, shape index: {}]  }
   0x1   :  { %s626_s17 = smov 0   ;;  %s628_s18 = smov 0  }
   0x2   :  { %s630_s19 = smov 0  }
   0x3 LB: > { %s23_s20 = sadd.s32 1, %s583_s17  ;;  %s26_s21 = sadd.s32 1, %s587_s18  ;;  %s591_s19 = sphi %s630_s19, %s14_s19   ;;  %s587_s18 = sphi %s628_s18, %s727_s18   ;;  %s583_s17 = sphi %s626_s17, %s726_s17   ;;  %s579_s16 = sphi %s624_s16, %s725_s16   ;;  %s575_s15 = sphi %s622_s15, %s724_s15  }
   0x4   : > { %p24_p0 = scmp.ge.s32.totalorder %s23_s20, 2  ;;  %p476_p1 = scmp.ge.s32.totalorder %s591_s19, 1 }
   0x5   : > { %p189_p2 = scmp.lt.s32.totalorder %s591_s19, 5 }
   0x6   : > { %s729_s20 = smov (%p24_p0, %s23_s20), 0  ;;  %s731_s21 = smov (!%p24_p0, %s26_s21), %s587_s18 }
   0x7   : > { %p190_p3 = pnand %p476_p1, %p189_p2  ;;  %p28_p4 = scmp.ge.s32.totalorder %s731_s21, 2 }
   0x8   : > { %v244_v0 = vld [vmem:[%s719_s2] sm:$0xff] (!%p190_p3)  ;;  %v245_v1 = vld [vmem:[%s719_s2 + $0x8] sm:$0xff] (!%p190_p3)  ;;  %v246_v2 = vld [vmem:[%s719_s2 + $0x10] sm:$0xff] (!%p190_p3)  ;;  %v593_v3 = vmov (!%p190_p3), 0.0|0.0   ;;  %vm594_vm0 = vmmov (!%p190_p3), 0   ;;  %v595_v6 = vmov (!%p190_p3), 0.0   ;;  %v341_v15 = vlaneseq (!%p190_p3) }
   0x9   : > { %s733_s21 = smov (%p28_p4, %s731_s21), 0  ;;  %193 = sbr.rel (%p190_p3) target bundleno = 523 (0x20b), region = 36 }
   0xa   : > { %501 = vmatprep.subr.bf16.mxu0 (!%p190_p3), %v593_v3  ;;  %v502_v4 = vpack.c.bf16 (!%p190_p3), %v245_v1, %v244_v0  ;;  %v247_v5 = vld [vmem:[%s719_s2 + $0x18] sm:$0xff] (!%p190_p3)  ;;  %498 = vmatprep.mubr.msk.f32.mxu0 (!%p190_p3), %vm594_vm0, %v595_v6  ;;  %p224_p5 = scmp.lt.s32.totalorder (!%p190_p3), %s579_s16, 1  ;;  %p226_p6 = scmp.lt.s32.totalorder (!%p190_p3), %s575_s15, 1  ;;  %vm255_vm1 = vcmask (!%p190_p3), 261120   ;;  %v481_v9 = vld [vmem:[%s720_s3] ss:$0 sm:$0xff] (!%p190_p3) }
   0xb   : > { %v505_v7 = vpack.c.bf16 (!%p190_p3), %v247_v5, %v246_v2  ;;  %s596_s13 = smov (!%p190_p3), 96   ;;  %p329_p7 = scmp.eq.s32.totalorder (!%p190_p3), %s575_s15, 0  ;;  %v342_v17 = vshrl.u32 (!%p190_p3), %v341_v15, 7  ;;  %v331_v19 = vld [vmem:[#allocation2] sm:$0x1] (!%p190_p3)  ;;  %vm353_vm3 = vcmask (!%p190_p3), 261127  }
   0xc   : > { %503 = vmatpush3.bf16.msra.mxu0 (!%p190_p3), %v502_v4  ;;  %vm375_vm6 = vcmask (!%p190_p3), 7168  }
   0xd   : > { %504 = vmatprep.subr.bf16.mxu0 (!%p190_p3), %v593_v3  ;;  %v349_v21 = vsub.s32 (!%p190_p3), 0, %v342_v17  ;;  %vm343_vm4 = vcmp.eq.s32.totalorder (!%p190_p3), %v342_v17, 0 }
  0x10   : > { %s735_s16 = smov (!%p224_p5, %s579_s16), 1  ;;  %506 = vmatpush3.bf16.msra.mxu0 %v505_v7 }
  0x11   : > { %s227_s30 = scalar_select %p226_p6, %s575_s15, 1 }
  0x12   : > { %s477_s5 = sshll.u32 %s735_s16, 1  ;;  %s234_s24 = scalar_lea.vmem %s718_s1, %s735_s16 }
  0x13   : > { %s668_s6 = sadd.s32 %s477_s5, %s227_s30  ;;  %v330_v18 = vld [vmem:[%s234_s24] sm:$0x1] }
  0x14   : > { %s478_s7 = sshll.u32 %s668_s6, 3 }
  0x15   : > { %s231_s10 = scalar_lea.vmem %s717_s0, %s478_s7  ;;  %s242_s25 = scalar_lea.vmem %s721_s4, %s478_s7 }
  0x16   : > { %v243_v8 = vld [vmem:[%s231_s10] sm:$0xff]  ;;  %s332_s14 = scalar_select %p329_p7, 1, 0 }
  0x17   : > { %499 = vmatmul.mubr.msk.f32.vlgmr.msra.gmra.mrb[0].mxu0 %vm255_vm1, %v243_v8 }
  0x18   : > { %v333_v16 = vstv %s332_s14 }
  0x19   : > { %vm685_vm2 = vcmp.eq.s32.totalorder %v333_v16, 1 }
  0x1a   : > { %v335_v22 = vsel %vm685_vm2, %v330_v18, %v331_v19  ;;  %vm373_vm5 = vmand %vm343_vm4, %vm685_vm2 }
  0x1b   : > { %v350_v23 = vrot.slane %v335_v22, %v349_v21 }
  0xea   : > { %v325_v10 = vpop.f32.mrb[0].mxu0 }
  0xeb   : > { %v326_v11 = vadd.f32 %v481_v9, %v325_v10  ;;  %v500_v12 = vpop.f32.mrb[1].mxu0 }
  0xed   : > { %337 = vrot.lane.b32.xlu0 %v326_v11, %s596_s13  ;;  %v359_v13 = vmul.f32 %v326_v11, %v326_v11 }
  0xef   : > { %v360_v14 = vsel %vm255_vm1, %v359_v13, 0.0 }
 0x10c   : > { %361 = vadd.xlane.f32.xlu0 %v360_v14 }
 0x15f   : > { %v338_v24 = vpop.permute.xlu0 %337 }
 0x160   : > { %v340_v25 = vrot.slane %v338_v24, 7  ;;  %354 = vst.msk [vmem:[#allocation2 - $0x7] sm:$0x80] %vm353_vm3, %v338_v24 }
 0x162   : > { %v352_v26 = vsel %vm343_vm4, %v350_v23, %v340_v25 }
 0x163   : > { %v363_v27 = vmul.f32 %v352_v26, %v352_v26  ;;  %v355_v29 = vmul.f32 %v352_v26, %v326_v11 }
 0x165   : > { %v364_v28 = vsel %vm255_vm1, %v363_v27, 0.0  ;;  %v356_v30 = vsel %vm255_vm1, %v355_v29, 0.0 }
 0x166   : > { %365 = vadd.xlane.f32.xlu1 %v364_v28 }
 0x16a   : > { %357 = vadd.xlane.f32.xlu1 %v356_v30 }
 0x199   : > { %v362_v31 = vpop.xlane.xlu0 %361 }
 0x1f3   : > { %v366_v32 = vpop.xlane.xlu1 %365 }
 0x1f4   : > { %v367_v33 = vmul.f32 %v366_v32, %v362_v31 }
 0x1f6   : > { %v368_v34 = vmax.f32 %v367_v33, 1e-16 }
 0x1f7   : > { %v358_v36 = vpop.xlane.xlu1 %357 }
 0x1f8   : > { %551 = vrsqrt.f32 %v368_v34 }
 0x202   : > { %v552_v35 = vpop.eup %551 }
 0x203   : > { %v370_v37 = vmul.f32 %v552_v35, %v358_v36 }
 0x205   : > { %v371_v38 = vsub.f32 1.0, %v370_v37 }
 0x207   : > { %v372_v39 = vmul.f32 0.5, %v371_v38 }
 0x209   : > { %v374_v40 = vsel %vm373_vm5, 1.0, %v372_v39 }
 0x20a   : > { %376 = vst.msk [vmem:[%s242_s25] sm:$0xff] %vm375_vm6, %v374_v40 }
 0x20b PF: > { %s14_s19 = sadd.s32 1, %s591_s19   ;;  %s724_s15 = smov %s583_s17 }
 0x20c   : > { %p11_p8 = scmp.ge.s32.totalorder %s14_s19, 6   ;;  %s725_s16 = smov %s587_s18 }
 0x20d   : > { %s726_s17 = smov %s729_s20  ;;  %s727_s18 = smov %s733_s21 }
 0x20e   :  { %13 = sbr.rel (!%p11_p8) target bundleno = 3 (0x3), region = 69 }

</bundles_post_ra>
